<compile_context>
chip_gen: v5e
topology: v5e:2x2
jax: 0.10.0
libtpu: 0.0.40
codegen_flags: <defaults>
</compile_context>

<pallas_src>
import functools

import jax
import jax.numpy as jnp
from jax.experimental import pallas as pl
from jax.experimental.pallas import tpu as pltpu

_LANE = 128


def _round_up(a, m):
    return ((a + m - 1) // m) * m


def _conv_relu_kernel(xp_ref, w_ref, b_ref, o_ref, *, C_in, C_out, K, S,
                      L_TILE, B_BLK):
    # xp_ref: (B_BLK, C_in*S, W)     polyphase window for this (batch-block, L-tile)
    #         xp[b, ci*S + p, q] == x[b, ci, (l0 + q)*S + p]
    # w_ref : (C_in*K, C_out, 1)     f32 weights, w_ref[ci*K + k, co, 0] = w[co, ci, k]
    # b_ref : (1, C_out, 1)          f32 bias
    # o_ref : (B_BLK, C_out, L_TILE) lane-dense output tile
    acc = jnp.broadcast_to(b_ref[...], (B_BLK, C_out, L_TILE))  # f32

    # Tiny contraction (C_in*K terms): unrolled VPU multiply-accumulates.
    # All offsets are static and tile-local; no per-term casts (weights/bias
    # arrive pre-cast), no dynamic unaligned slices.
    for ci in range(C_in):
        for k in range(K):
            row = ci * S + (k % S)        # polyphase row
            d = k // S                    # static shift within the tile (0..halo)
            xs = xp_ref[:, row:row + 1, d:d + L_TILE].astype(jnp.float32)  # (B_BLK,1,L_TILE)
            wk = w_ref[ci * K + k:ci * K + k + 1]                          # (1,C_out,1)
            acc = acc + wk * xs

    o_ref[...] = jnp.maximum(acc, 0.0).astype(o_ref.dtype)


def conv1d_relu(x, weight, bias, stride):
    """x: (B, C_in, L), weight: (C_out, C_in, K), bias: (C_out,) -> (B, C_out, L_out)."""
    B, C_in, L = x.shape
    C_out, _, K = weight.shape
    S = int(stride)
    assert L >= K, "input shorter than kernel"
    L_out = (L - K) // S + 1
    halo = (K - 1) // S                       # extra polyphase columns past a tile

    # --- L tiling: large lane-dense tiles, accumulator capped at ~64 KB f32 ---
    lane_budget = max(_LANE, ((65536 // (4 * C_out)) // _LANE) * _LANE)
    L_TILE_MAX = max(_LANE, min(2048, lane_budget))
    L_out_pad = _round_up(L_out, _LANE)
    if L_out_pad <= L_TILE_MAX:
        L_TILE = L_out_pad
    else:
        L_TILE = L_TILE_MAX
        L_out_pad = _round_up(L_out, L_TILE)
    nL = L_out_pad // L_TILE

    # --- batch blocking: collapse tiny problems into few grid steps ---
    max_bblk = max(1, 65536 // (C_out * L_TILE * 4))
    B_BLK = 1
    for cand in range(min(B, max_bblk), 0, -1):
        if B % cand == 0:
            B_BLK = cand
            break
    nB = B // B_BLK

    # --- polyphase re-layout (no K-times im2col inflation) ---
    # xp[b, ci*S + p, q] = x[b, ci, q*S + p]
    halo_pad = _round_up(halo, _LANE) if halo > 0 else 0
    W = L_TILE + halo_pad                          # per-tile window width (lanes)
    Q_src = max(L_out_pad + halo_pad, -(-L // S))  # polyphase source length
    L_pad = Q_src * S
    xp = jnp.pad(x, ((0, 0), (0, 0), (0, L_pad - L)))
    xp = xp.reshape(B, C_in, Q_src, S).transpose(0, 1, 3, 2).reshape(B, C_in * S, Q_src)

    # Per-(batch, L-tile) windows of width W (overlap only by the small halo).
    if nL == 1:
        xp_tiled = xp[:, :, :W][:, None, :, :]
    elif halo_pad == 0:
        xp_tiled = xp[:, :, :L_out_pad].reshape(B, C_in * S, nL, L_TILE)
        xp_tiled = xp_tiled.transpose(0, 2, 1, 3)
    else:
        col = jnp.arange(nL)[:, None] * L_TILE + jnp.arange(W)[None, :]
        xp_tiled = jnp.take(xp, col, axis=2)       # (B, C_in*S, nL, W)
        xp_tiled = xp_tiled.transpose(0, 2, 1, 3)  # (B, nL, C_in*S, W)

    # Weights pre-cast + pre-laid-out so the kernel needs no per-term casts or
    # unaligned lane slices: w3[ci*K + k, co, 0] = weight[co, ci, k].
    w3 = weight.reshape(C_out, C_in * K).T.reshape(C_in * K, C_out, 1).astype(jnp.float32)
    b3 = bias.reshape(1, C_out, 1).astype(jnp.float32)

    kernel = functools.partial(
        _conv_relu_kernel, C_in=C_in, C_out=C_out, K=K, S=S,
        L_TILE=L_TILE, B_BLK=B_BLK)

    itemsize = x.dtype.itemsize
    cost = pl.CostEstimate(
        flops=2 * B * L_out_pad * C_in * K * C_out,
        transcendentals=0,
        bytes_accessed=(xp_tiled.size * itemsize + w3.size * 4 + b3.size * 4
                        + B * C_out * L_out_pad * itemsize),
    )

    # Explicit scoped-VMEM sizing (double-buffered blocks + constants, padded
    # to (8, 128) layout), with headroom; keeps us honest on v7x's 64 MiB.
    in_blk = B_BLK * _round_up(C_in * S, 8) * W * itemsize
    out_blk = B_BLK * _round_up(C_out, 8) * L_TILE * itemsize
    w_blk = C_in * K * _round_up(C_out, 8) * _LANE * 4
    b_blk = _round_up(C_out, 8) * _LANE * 4
    vmem_need = 2 * (in_blk + out_blk + w_blk + b_blk)
    vmem_limit = int(min(96 * 2 ** 20, max(16 * 2 ** 20, 2 * vmem_need + (2 << 20))))

    out = pl.pallas_call(
        kernel,
        out_shape=jax.ShapeDtypeStruct((B, C_out, L_out_pad), x.dtype),
        grid=(nB, nL),
        in_specs=[
            # Per-(batch-block, L-tile) polyphase window: VMEM ~ O(L_TILE),
            # DMA pipelined per grid step.
            pl.BlockSpec((B_BLK, None, C_in * S, W), lambda bg, j: (bg, j, 0, 0)),
            pl.BlockSpec((C_in * K, C_out, 1), lambda bg, j: (0, 0, 0)),
            pl.BlockSpec((1, C_out, 1), lambda bg, j: (0, 0, 0)),
        ],
        out_specs=pl.BlockSpec((B_BLK, C_out, L_TILE), lambda bg, j: (bg, 0, j)),
        compiler_params=pltpu.CompilerParams(
            dimension_semantics=("parallel", "parallel"),
            vmem_limit_bytes=vmem_limit),
        cost_estimate=cost,
    )(xp_tiled, w3, b3)

    # Drop lane padding; output is already in PyTorch (B, C_out, L_out) layout.
    return out[:, :, :L_out]


if __name__ == "__main__":
    # Module config: Conv(stride=2, kernel=3, in_channels=4, out_channels=8)
    stride, kernel, in_channels, out_channels = 2, 3, 4, 8
    B, L = 2, 16

    key = jax.random.PRNGKey(0)
    kx, kw, kb = jax.random.split(key, 3)

    # Deterministic parameter init mimicking PyTorch Conv1d default:
    # uniform(-1/sqrt(fan_in), 1/sqrt(fan_in)), fan_in = in_channels * kernel
    fan_in = in_channels * kernel
    bound = 1.0 / jnp.sqrt(jnp.float32(fan_in))
    weight = jax.random.uniform(kw, (out_channels, in_channels, kernel),
                                jnp.float32, -bound, bound)
    bias = jax.random.uniform(kb, (out_channels,), jnp.float32, -bound, bound)

    x = jax.random.normal(kx, (B, in_channels, L), jnp.float32)

    out = conv1d_relu(x, weight, bias, stride)
    out = jax.block_until_ready(out)

    # Reference: lax conv (NCW layout) + bias + ReLU.
    ref = jax.lax.conv_general_dilated(
        x, weight, window_strides=(stride,), padding="VALID",
        dimension_numbers=("NCH", "OIH", "NCH"))
    ref = jnp.maximum(ref + bias[None, :, None], 0.0)

    assert out.shape == ref.shape, (out.shape, ref.shape)
    assert jnp.allclose(out, ref, atol=1e-5, rtol=1e-5)
    print("KERNEL_OK")
</pallas_src>

<mosaic_0001>
module attributes {stable_mosaic.version = 11 : i64} {
  func.func @_conv_relu_kernel(%arg0: i32, %arg1: i32, %arg2: memref<2x1x8x256xf32, #tpu.memory_space<vmem>>, %arg3: memref<12x8x1xf32, #tpu.memory_space<vmem>>, %arg4: memref<1x8x1xf32, #tpu.memory_space<vmem>>, %arg5: memref<2x8x128xf32, #tpu.memory_space<vmem>>) attributes {dimension_semantics = [#tpu.dimension_semantics<parallel>, #tpu.dimension_semantics<parallel>], iteration_bounds = array<i64: 1, 1>, scalar_prefetch = 0 : i64, scratch_operands = 0 : i64, tpu.core_type = #tpu.core_type<tc>, window_params = [{transform_indices = @transform_0, window_bounds = array<i64: 2, 1, 8, 256>}, {pipeline_mode = #tpu.pipeline_mode<synchronous>, transform_indices = @transform_1, window_bounds = array<i64: 12, 8, 1>}, {pipeline_mode = #tpu.pipeline_mode<synchronous>, transform_indices = @transform_2, window_bounds = array<i64: 1, 8, 1>}, {transform_indices = @transform_3, window_bounds = array<i64: 2, 8, 128>}]} {
    %c0 = arith.constant 0 : index
    %c0_0 = arith.constant 0 : index
    %c0_1 = arith.constant 0 : index
    %0 = vector.load %arg4[%c0, %c0_0, %c0_1] : memref<1x8x1xf32, #tpu.memory_space<vmem>>, vector<1x8x1xf32>
    %1 = vector.shape_cast %0 : vector<1x8x1xf32> to vector<1x8x1xf32>
    %2 = vector.broadcast %1 : vector<1x8x1xf32> to vector<2x8x128xf32>
    %c0_2 = arith.constant 0 : index
    %c0_3 = arith.constant 0 : index
    %c0_4 = arith.constant 0 : index
    %c0_5 = arith.constant 0 : index
    %3 = vector.load %arg2[%c0_2, %c0_3, %c0_4, %c0_5] : memref<2x1x8x256xf32, #tpu.memory_space<vmem>>, vector<2x1x1x128xf32>
    %4 = vector.shape_cast %3 : vector<2x1x1x128xf32> to vector<2x1x128xf32>
    %c0_6 = arith.constant 0 : index
    %c0_7 = arith.constant 0 : index
    %c0_8 = arith.constant 0 : index
    %5 = vector.load %arg3[%c0_6, %c0_7, %c0_8] : memref<12x8x1xf32, #tpu.memory_space<vmem>>, vector<1x8x1xf32>
    %6 = vector.broadcast %5 : vector<1x8x1xf32> to vector<2x8x128xf32>
    %7 = vector.broadcast %4 : vector<2x1x128xf32> to vector<2x8x128xf32>
    %8 = arith.mulf %6, %7 : vector<2x8x128xf32>
    %9 = arith.addf %2, %8 : vector<2x8x128xf32>
    %c0_9 = arith.constant 0 : index
    %c0_10 = arith.constant 0 : index
    %c1 = arith.constant 1 : index
    %c0_11 = arith.constant 0 : index
    %10 = vector.load %arg2[%c0_9, %c0_10, %c1, %c0_11] : memref<2x1x8x256xf32, #tpu.memory_space<vmem>>, vector<2x1x1x128xf32>
    %11 = vector.shape_cast %10 : vector<2x1x1x128xf32> to vector<2x1x128xf32>
    %c1_12 = arith.constant 1 : index
    %c0_13 = arith.constant 0 : index
    %c0_14 = arith.constant 0 : index
    %12 = vector.load %arg3[%c1_12, %c0_13, %c0_14] : memref<12x8x1xf32, #tpu.memory_space<vmem>>, vector<1x8x1xf32>
    %13 = vector.broadcast %12 : vector<1x8x1xf32> to vector<2x8x128xf32>
    %14 = vector.broadcast %11 : vector<2x1x128xf32> to vector<2x8x128xf32>
    %15 = arith.mulf %13, %14 : vector<2x8x128xf32>
    %16 = arith.addf %9, %15 : vector<2x8x128xf32>
    %c0_15 = arith.constant 0 : index
    %c0_16 = arith.constant 0 : index
    %c0_17 = arith.constant 0 : index
    %c1_18 = arith.constant 1 : index
    %17 = vector.load %arg2[%c0_15, %c0_16, %c0_17, %c1_18] : memref<2x1x8x256xf32, #tpu.memory_space<vmem>>, vector<2x1x1x128xf32>
    %18 = vector.shape_cast %17 : vector<2x1x1x128xf32> to vector<2x1x128xf32>
    %c2 = arith.constant 2 : index
    %c0_19 = arith.constant 0 : index
    %c0_20 = arith.constant 0 : index
    %19 = vector.load %arg3[%c2, %c0_19, %c0_20] : memref<12x8x1xf32, #tpu.memory_space<vmem>>, vector<1x8x1xf32>
    %20 = vector.broadcast %19 : vector<1x8x1xf32> to vector<2x8x128xf32>
    %21 = vector.broadcast %18 : vector<2x1x128xf32> to vector<2x8x128xf32>
    %22 = arith.mulf %20, %21 : vector<2x8x128xf32>
    %23 = arith.addf %16, %22 : vector<2x8x128xf32>
    %c0_21 = arith.constant 0 : index
    %c0_22 = arith.constant 0 : index
    %c2_23 = arith.constant 2 : index
    %c0_24 = arith.constant 0 : index
    %24 = vector.load %arg2[%c0_21, %c0_22, %c2_23, %c0_24] : memref<2x1x8x256xf32, #tpu.memory_space<vmem>>, vector<2x1x1x128xf32>
    %25 = vector.shape_cast %24 : vector<2x1x1x128xf32> to vector<2x1x128xf32>
    %c3 = arith.constant 3 : index
    %c0_25 = arith.constant 0 : index
    %c0_26 = arith.constant 0 : index
    %26 = vector.load %arg3[%c3, %c0_25, %c0_26] : memref<12x8x1xf32, #tpu.memory_space<vmem>>, vector<1x8x1xf32>
    %27 = vector.broadcast %26 : vector<1x8x1xf32> to vector<2x8x128xf32>
    %28 = vector.broadcast %25 : vector<2x1x128xf32> to vector<2x8x128xf32>
    %29 = arith.mulf %27, %28 : vector<2x8x128xf32>
    %30 = arith.addf %23, %29 : vector<2x8x128xf32>
    %c0_27 = arith.constant 0 : index
    %c0_28 = arith.constant 0 : index
    %c3_29 = arith.constant 3 : index
    %c0_30 = arith.constant 0 : index
    %31 = vector.load %arg2[%c0_27, %c0_28, %c3_29, %c0_30] : memref<2x1x8x256xf32, #tpu.memory_space<vmem>>, vector<2x1x1x128xf32>
    %32 = vector.shape_cast %31 : vector<2x1x1x128xf32> to vector<2x1x128xf32>
    %c4 = arith.constant 4 : index
    %c0_31 = arith.constant 0 : index
    %c0_32 = arith.constant 0 : index
    %33 = vector.load %arg3[%c4, %c0_31, %c0_32] : memref<12x8x1xf32, #tpu.memory_space<vmem>>, vector<1x8x1xf32>
    %34 = vector.broadcast %33 : vector<1x8x1xf32> to vector<2x8x128xf32>
    %35 = vector.broadcast %32 : vector<2x1x128xf32> to vector<2x8x128xf32>
    %36 = arith.mulf %34, %35 : vector<2x8x128xf32>
    %37 = arith.addf %30, %36 : vector<2x8x128xf32>
    %c0_33 = arith.constant 0 : index
    %c0_34 = arith.constant 0 : index
    %c2_35 = arith.constant 2 : index
    %c1_36 = arith.constant 1 : index
    %38 = vector.load %arg2[%c0_33, %c0_34, %c2_35, %c1_36] : memref<2x1x8x256xf32, #tpu.memory_space<vmem>>, vector<2x1x1x128xf32>
    %39 = vector.shape_cast %38 : vector<2x1x1x128xf32> to vector<2x1x128xf32>
    %c5 = arith.constant 5 : index
    %c0_37 = arith.constant 0 : index
    %c0_38 = arith.constant 0 : index
    %40 = vector.load %arg3[%c5, %c0_37, %c0_38] : memref<12x8x1xf32, #tpu.memory_space<vmem>>, vector<1x8x1xf32>
    %41 = vector.broadcast %40 : vector<1x8x1xf32> to vector<2x8x128xf32>
    %42 = vector.broadcast %39 : vector<2x1x128xf32> to vector<2x8x128xf32>
    %43 = arith.mulf %41, %42 : vector<2x8x128xf32>
    %44 = arith.addf %37, %43 : vector<2x8x128xf32>
    %c0_39 = arith.constant 0 : index
    %c0_40 = arith.constant 0 : index
    %c4_41 = arith.constant 4 : index
    %c0_42 = arith.constant 0 : index
    %45 = vector.load %arg2[%c0_39, %c0_40, %c4_41, %c0_42] : memref<2x1x8x256xf32, #tpu.memory_space<vmem>>, vector<2x1x1x128xf32>
    %46 = vector.shape_cast %45 : vector<2x1x1x128xf32> to vector<2x1x128xf32>
    %c6 = arith.constant 6 : index
    %c0_43 = arith.constant 0 : index
    %c0_44 = arith.constant 0 : index
    %47 = vector.load %arg3[%c6, %c0_43, %c0_44] : memref<12x8x1xf32, #tpu.memory_space<vmem>>, vector<1x8x1xf32>
    %48 = vector.broadcast %47 : vector<1x8x1xf32> to vector<2x8x128xf32>
    %49 = vector.broadcast %46 : vector<2x1x128xf32> to vector<2x8x128xf32>
    %50 = arith.mulf %48, %49 : vector<2x8x128xf32>
    %51 = arith.addf %44, %50 : vector<2x8x128xf32>
    %c0_45 = arith.constant 0 : index
    %c0_46 = arith.constant 0 : index
    %c5_47 = arith.constant 5 : index
    %c0_48 = arith.constant 0 : index
    %52 = vector.load %arg2[%c0_45, %c0_46, %c5_47, %c0_48] : memref<2x1x8x256xf32, #tpu.memory_space<vmem>>, vector<2x1x1x128xf32>
    %53 = vector.shape_cast %52 : vector<2x1x1x128xf32> to vector<2x1x128xf32>
    %c7 = arith.constant 7 : index
    %c0_49 = arith.constant 0 : index
    %c0_50 = arith.constant 0 : index
    %54 = vector.load %arg3[%c7, %c0_49, %c0_50] : memref<12x8x1xf32, #tpu.memory_space<vmem>>, vector<1x8x1xf32>
    %55 = vector.broadcast %54 : vector<1x8x1xf32> to vector<2x8x128xf32>
    %56 = vector.broadcast %53 : vector<2x1x128xf32> to vector<2x8x128xf32>
    %57 = arith.mulf %55, %56 : vector<2x8x128xf32>
    %58 = arith.addf %51, %57 : vector<2x8x128xf32>
    %c0_51 = arith.constant 0 : index
    %c0_52 = arith.constant 0 : index
    %c4_53 = arith.constant 4 : index
    %c1_54 = arith.constant 1 : index
    %59 = vector.load %arg2[%c0_51, %c0_52, %c4_53, %c1_54] : memref<2x1x8x256xf32, #tpu.memory_space<vmem>>, vector<2x1x1x128xf32>
    %60 = vector.shape_cast %59 : vector<2x1x1x128xf32> to vector<2x1x128xf32>
    %c8 = arith.constant 8 : index
    %c0_55 = arith.constant 0 : index
    %c0_56 = arith.constant 0 : index
    %61 = vector.load %arg3[%c8, %c0_55, %c0_56] : memref<12x8x1xf32, #tpu.memory_space<vmem>>, vector<1x8x1xf32>
    %62 = vector.broadcast %61 : vector<1x8x1xf32> to vector<2x8x128xf32>
    %63 = vector.broadcast %60 : vector<2x1x128xf32> to vector<2x8x128xf32>
    %64 = arith.mulf %62, %63 : vector<2x8x128xf32>
    %65 = arith.addf %58, %64 : vector<2x8x128xf32>
    %c0_57 = arith.constant 0 : index
    %c0_58 = arith.constant 0 : index
    %c6_59 = arith.constant 6 : index
    %c0_60 = arith.constant 0 : index
    %66 = vector.load %arg2[%c0_57, %c0_58, %c6_59, %c0_60] : memref<2x1x8x256xf32, #tpu.memory_space<vmem>>, vector<2x1x1x128xf32>
    %67 = vector.shape_cast %66 : vector<2x1x1x128xf32> to vector<2x1x128xf32>
    %c9 = arith.constant 9 : index
    %c0_61 = arith.constant 0 : index
    %c0_62 = arith.constant 0 : index
    %68 = vector.load %arg3[%c9, %c0_61, %c0_62] : memref<12x8x1xf32, #tpu.memory_space<vmem>>, vector<1x8x1xf32>
    %69 = vector.broadcast %68 : vector<1x8x1xf32> to vector<2x8x128xf32>
    %70 = vector.broadcast %67 : vector<2x1x128xf32> to vector<2x8x128xf32>
    %71 = arith.mulf %69, %70 : vector<2x8x128xf32>
    %72 = arith.addf %65, %71 : vector<2x8x128xf32>
    %c0_63 = arith.constant 0 : index
    %c0_64 = arith.constant 0 : index
    %c7_65 = arith.constant 7 : index
    %c0_66 = arith.constant 0 : index
    %73 = vector.load %arg2[%c0_63, %c0_64, %c7_65, %c0_66] : memref<2x1x8x256xf32, #tpu.memory_space<vmem>>, vector<2x1x1x128xf32>
    %74 = vector.shape_cast %73 : vector<2x1x1x128xf32> to vector<2x1x128xf32>
    %c10 = arith.constant 10 : index
    %c0_67 = arith.constant 0 : index
    %c0_68 = arith.constant 0 : index
    %75 = vector.load %arg3[%c10, %c0_67, %c0_68] : memref<12x8x1xf32, #tpu.memory_space<vmem>>, vector<1x8x1xf32>
    %76 = vector.broadcast %75 : vector<1x8x1xf32> to vector<2x8x128xf32>
    %77 = vector.broadcast %74 : vector<2x1x128xf32> to vector<2x8x128xf32>
    %78 = arith.mulf %76, %77 : vector<2x8x128xf32>
    %79 = arith.addf %72, %78 : vector<2x8x128xf32>
    %c0_69 = arith.constant 0 : index
    %c0_70 = arith.constant 0 : index
    %c6_71 = arith.constant 6 : index
    %c1_72 = arith.constant 1 : index
    %80 = vector.load %arg2[%c0_69, %c0_70, %c6_71, %c1_72] : memref<2x1x8x256xf32, #tpu.memory_space<vmem>>, vector<2x1x1x128xf32>
    %81 = vector.shape_cast %80 : vector<2x1x1x128xf32> to vector<2x1x128xf32>
    %c11 = arith.constant 11 : index
    %c0_73 = arith.constant 0 : index
    %c0_74 = arith.constant 0 : index
    %82 = vector.load %arg3[%c11, %c0_73, %c0_74] : memref<12x8x1xf32, #tpu.memory_space<vmem>>, vector<1x8x1xf32>
    %83 = vector.broadcast %82 : vector<1x8x1xf32> to vector<2x8x128xf32>
    %84 = vector.broadcast %81 : vector<2x1x128xf32> to vector<2x8x128xf32>
    %85 = arith.mulf %83, %84 : vector<2x8x128xf32>
    %86 = arith.addf %79, %85 : vector<2x8x128xf32>
    %cst = arith.constant 0.000000e+00 : f32
    %87 = vector.broadcast %cst : f32 to vector<2x8x128xf32>
    %88 = arith.maximumf %86, %87 : vector<2x8x128xf32>
    %c0_75 = arith.constant 0 : index
    %c0_76 = arith.constant 0 : index
    %c0_77 = arith.constant 0 : index
    %89 = vector.load %arg5[%c0_75, %c0_76, %c0_77] : memref<2x8x128xf32, #tpu.memory_space<vmem>>, vector<2x8x128xf32>
    tpu.vector_store %arg5[%c0_75, %c0_76, %c0_77], %88 {strides = array<i32>} : memref<2x8x128xf32, #tpu.memory_space<vmem>>, vector<2x8x128xf32>,
    return
  }
  func.func @transform_0(%arg0: i32, %arg1: i32) -> (i32, i32, i32, i32) {
    %c0_i32 = arith.constant 0 : i32
    %c0_i32_0 = arith.constant 0 : i32
    %c0_i32_1 = arith.constant 0 : i32
    return %arg0, %arg1, %c0_i32, %c0_i32_0 : i32, i32, i32, i32
  }
  func.func @transform_1(%arg0: i32, %arg1: i32) -> (i32, i32, i32) {
    %c0_i32 = arith.constant 0 : i32
    %c0_i32_0 = arith.constant 0 : i32
    %c0_i32_1 = arith.constant 0 : i32
    %c0_i32_2 = arith.constant 0 : i32
    return %c0_i32, %c0_i32_0, %c0_i32_1 : i32, i32, i32
  }
  func.func @transform_2(%arg0: i32, %arg1: i32) -> (i32, i32, i32) {
    %c0_i32 = arith.constant 0 : i32
    %c0_i32_0 = arith.constant 0 : i32
    %c0_i32_1 = arith.constant 0 : i32
    %c0_i32_2 = arith.constant 0 : i32
    return %c0_i32, %c0_i32_0, %c0_i32_1 : i32, i32, i32
  }
  func.func @transform_3(%arg0: i32, %arg1: i32) -> (i32, i32, i32) {
    %c0_i32 = arith.constant 0 : i32
    %c0_i32_0 = arith.constant 0 : i32
    return %arg0, %c0_i32, %arg1 : i32, i32, i32
  }
}

</mosaic_0001>

<bundles_post_ra>
// kernel: tpu_custom_call.1
= control target key start
LH: loop header
LB: loop body
LE: loop exit
PB: predicated region body
PF: predicated region fallthrough
CT: control target
= control target key end

     0   :  { %v324_v2 = vmov 0   ;;  %s495_s0 = inlined_call_operand.vmem [shape: f32[2,1,8,256], index: 0, kind: input, shape index: {}]   ;;  %s496_s1 = inlined_call_operand.vmem [shape: f32[12,8,1], index: 1, kind: input, shape index: {}]   ;;  %s497_s2 = inlined_call_operand.vmem [shape: f32[1,8,1], index: 2, kind: input, shape index: {}]   ;;  %s498_s3 = inlined_call_operand.hbm [shape: f32[2,8,128], index: 3, kind: output, shape index: {}]  }
   0x1   :  { %v279_v0 = vld [vmem:[%s496_s1 + $0x8] sm:$0xff]  ;;  %v15_v1 = vld [vmem:[%s497_s2] sm:$0xff]  ;;  %296 = vset.pattern.permute.xlu1 %v324_v2  ;;  %295 = vset.pattern.permute.xlu0 %v324_v2 }
   0x2   :  { %39 = vperm.xlu1 %296, %v279_v0   ;;  %18 = vperm.xlu0 %295, %v15_v1  }
   0x3   :  { %297 = vset.pattern.permute.xlu2 %v324_v2 }
   0x4   :  { %8 = vsyncpa [#allocation3], 0  ;;  %v280_v3 = vld [vmem:[%s496_s1 + $0x10] sm:$0xff]  ;;  %v23_v4 = vld [vmem:[%s496_s1] sm:$0xff]  ;;  %s325_s19 = smov 127   ;;  %vm73_vm0 = vcmask 1039360  }
   0x5   :  { %v289_v5 = vld [vmem:[%s496_s1 + $0x58] sm:$0xff]  ;;  %v286_v6 = vld [vmem:[%s496_s1 + $0x40] sm:$0xff]  ;;  %v283_v7 = vld [vmem:[%s496_s1 + $0x28] sm:$0xff]  ;;  %s326_s28 = smov [#allocation2]   ;;  %s267_s5 = sshll.u32 %s498_s3, 4  ;;  %s268_s5 = int_to_ptr.hbm [resolvable:$true] %s267_s5 }
   0x6   :  { %232 = vperm.xlu2 %297, %v289_v5   ;;  %v281_v8 = vld [vmem:[%s496_s1 + $0x18] sm:$0xff]  ;;  %v282_v9 = vld [vmem:[%s496_s1 + $0x20] sm:$0xff]  ;;  %v284_v10 = vld [vmem:[%s496_s1 + $0x30] sm:$0xff]  ;;  %s265_s29 = sshll.u32 %s326_s28, 4  ;;  %s328_s6 = smov 8   ;;  %s266_s29 = int_to_ptr.vmem [resolvable:$true] %s265_s29 }
   0x7   :  { %v285_v11 = vld [vmem:[%s496_s1 + $0x38] sm:$0xff]  ;;  %v287_v12 = vld [vmem:[%s496_s1 + $0x48] sm:$0xff]  ;;  %v288_v13 = vld [vmem:[%s496_s1 + $0x50] sm:$0xff] }
   0x8   :  { %v21_v16 = vld [vmem:[%s495_s0] ss:$0 sm:$0xff]  ;;  %v22_v17 = vld [vmem:[%s495_s0 + $0x10] ss:$0 sm:$0xff]  ;;  %v49_v18 = vld [vmem:[%s495_s0 + $0x18] ss:$0 sm:$0xff] }
   0x9   :  { %v33_v19 = vld [vmem:[%s495_s0 + $0x1] ss:$0 sm:$0xff]  ;;  %v34_v22 = vld [vmem:[%s495_s0 + $0x11] ss:$0 sm:$0xff]  ;;  %v47_v33 = vld [vmem:[%s495_s0 + $0x8] ss:$0 sm:$0xff] }
   0xa   :  { %54 = vperm.xlu1 %296, %v280_v3   ;;  %26 = vperm.xlu0 %295, %v23_v4   ;;  %v108_v34 = vld [vmem:[%s495_s0 + $0x12] ss:$0 sm:$0xff]  ;;  %v106_v35 = vld [vmem:[%s495_s0 + $0x2] ss:$0 sm:$0xff]  ;;  %v107_v41 = vld [vmem:[%s495_s0 + $0xa] ss:$0 sm:$0xff] }
   0xb   :  { %v109_v42 = vld [vmem:[%s495_s0 + $0x1a] ss:$0 sm:$0xff]  ;;  %v427_v44 = vld [vmem:[%s495_s0 + $0x14] ss:$0 sm:$0xff]  ;;  %v436_v48 = vld [vmem:[%s495_s0 + $0x16] ss:$0 sm:$0xff] }
   0xc   :  { %v166_v49 = vld [vmem:[%s495_s0 + $0xc] ss:$0 sm:$0xff]  ;;  %v165_v50 = vld [vmem:[%s495_s0 + $0x4] ss:$0 sm:$0xff]  ;;  %v225_v55 = vld [vmem:[%s495_s0 + $0xe] ss:$0 sm:$0xff] }
   0xd   :  { %v168_v56 = vld [vmem:[%s495_s0 + $0x1c] ss:$0 sm:$0xff]  ;;  %v198_v59 = vld [vmem:[%s495_s0 + $0x6] ss:$0 sm:$0xff]  ;;  %v227_v61 = vld [vmem:[%s495_s0 + $0x1e] ss:$0 sm:$0xff] }
   0xe   :  { %86 = vperm.xlu2 %297, %v281_v8  }
  0x12   :  { %173 = vperm.xlu1 %296, %v286_v6   ;;  %114 = vperm.xlu0 %295, %v283_v7  }
  0x16   :  { %145 = vperm.xlu2 %297, %v284_v10  }
  0x1a   :  { %99 = vperm.xlu0 %295, %v282_v9  }
  0x1e   :  { %204 = vperm.xlu2 %297, %v287_v12  }
  0x22   :  { %158 = vperm.xlu0 %295, %v285_v11  }
  0x2a   :  { %217 = vperm.xlu0 %295, %v288_v13  }
  0x60   :  { %v233_v51 = vpop.permute.xlu2 %232 }
  0x61   :  { %v237_v52 = vmul.f32 %v233_v51, %v436_v48  ;;  %v236_v57 = vmul.f32 %v233_v51, %v225_v55  ;;  %v235_v60 = vmul.f32 %v233_v51, %v198_v59  ;;  %v238_v62 = vmul.f32 %v233_v51, %v227_v61  ;;  %v212_v61 = vld [vmem:[%s495_s0 + $0x17] ss:$0 sm:$0xff] }
  0x68   :  { %v87_v63 = vpop.permute.xlu2 %86 }
  0x69   :  { %v89_v7 = vmul.f32 %v106_v35, %v87_v63 }
  0x70   :  { %v146_v0 = vpop.permute.xlu2 %145 }
  0x74   :  { %v40_v14 = vpop.permute.xlu1 %39  ;;  %v19_v15 = vpop.permute.xlu0 %18 }
  0x75   :  { %v42_v28 = vmul.f32 %v40_v14, %v33_v19  ;;  %v43_v31 = vmul.f32 %v40_v14, %v34_v22  ;;  %v93_v14 = vld [vmem:[%s495_s0 + $0x3] ss:$0 sm:$0xff] }
  0x78   :  { %v205_v1 = vpop.permute.xlu2 %204 }
  0x79   :  { %v208_v51 = vmul.f32 %v205_v1, %v436_v48 }
  0x7c   :  { %v55_v20 = vpop.permute.xlu1 %54  ;;  %v27_v21 = vpop.permute.xlu0 %26 }
  0x7d   :  { %v29_v23 = vmul.f32 %v27_v21, %v21_v16  ;;  %v30_v24 = vmul.f32 %v27_v21, %v22_v17  ;;  %v60_v25 = vmul.f32 %v55_v20, %v49_v18  ;;  %v57_v26 = vmul.f32 %v55_v20, %v21_v16 }
  0x7e   :  { %v59_v27 = vmul.f32 %v55_v20, %v22_v17  ;;  %v58_v38 = vmul.f32 %v55_v20, %v47_v33 }
  0x7f   :  { %v31_v29 = vadd.f32 %v29_v23, %v19_v15  ;;  %v32_v30 = vadd.f32 %v30_v24, %v19_v15  ;;  %71 = vrot.lane.b32.xlu1 %v60_v25, %s325_s19  ;;  %65 = vrot.lane.b32.xlu2 %v57_v26, %s325_s19  ;;  %v90_v15 = vmul.f32 %v108_v34, %v87_v63  ;;  %v94_v25 = vld [vmem:[%s495_s0 + $0x13] ss:$0 sm:$0xff] }
  0x80   :  { %69 = vrot.lane.b32.xlu0 %v59_v27, %s325_s19  ;;  %v148_v23 = vmul.f32 %v165_v50, %v146_v0 }
  0x81   :  { %v44_v32 = vadd.f32 %v42_v28, %v31_v29  ;;  %v45_v36 = vadd.f32 %v43_v31, %v32_v30 }
  0x84   :  { %v115_v37 = vpop.permute.xlu0 %114  ;;  %v174_v43 = vpop.permute.xlu1 %173 }
  0x85   :  { %v119_v39 = vmul.f32 %v115_v37, %v108_v34  ;;  %v117_v40 = vmul.f32 %v115_v37, %v106_v35  ;;  %v118_v45 = vmul.f32 %v115_v37, %v107_v41  ;;  %v120_v46 = vmul.f32 %v115_v37, %v109_v42  ;;  %v152_v34 = vld [vmem:[%s495_s0 + $0x5] ss:$0 sm:$0xff] }
  0x86   :  { %v178_v47 = vmul.f32 %v174_v43, %v427_v44  ;;  %v177_v53 = vmul.f32 %v174_v43, %v166_v49  ;;  %v176_v54 = vmul.f32 %v174_v43, %v165_v50  ;;  %v179_v58 = vmul.f32 %v174_v43, %v168_v56  ;;  %v153_v43 = vld [vmem:[%s495_s0 + $0x15] ss:$0 sm:$0xff] }
  0x87   :  { %67 = vrot.lane.b32.xlu2 %v58_v38, %s325_s19  ;;  %125 = vrot.lane.b32.xlu1 %v117_v40, %s325_s19  ;;  %v207_v41 = vmul.f32 %v205_v1, %v198_v59 }
  0x88   :  { %129 = vrot.lane.b32.xlu0 %v119_v39, %s325_s19 }
  0x8c   :  { %v100_v2 = vpop.permute.xlu0 %99 }
  0x8d   :  { %v102_v18 = vmul.f32 %v100_v2, %v93_v14  ;;  %v103_v27 = vmul.f32 %v100_v2, %v94_v25 }
  0x8f   :  { %127 = vrot.lane.b32.xlu2 %v118_v45, %s325_s19  ;;  %131 = vrot.lane.b32.xlu1 %v120_v46, %s325_s19 }
  0x90   :  { %188 = vrot.lane.b32.xlu0 %v178_v47, %s325_s19 }
  0x94   :  { %v159_v4 = vpop.permute.xlu0 %158 }
  0x97   :  { %186 = vrot.lane.b32.xlu2 %v177_v53, %s325_s19  ;;  %184 = vrot.lane.b32.xlu1 %v176_v54, %s325_s19  ;;  %v211_v53 = vld [vmem:[%s495_s0 + $0x7] ss:$0 sm:$0xff]  ;;  %s327_s0 = smov 128  }
  0x98   :  { %247 = vrot.lane.b32.xlu0 %v237_v52, %s325_s19 }
  0x9c   :  { %v218_v10 = vpop.permute.xlu0 %217 }
  0x9d   :  { %v220_v55 = vmul.f32 %v218_v10, %v211_v53  ;;  %v221_v63 = vmul.f32 %v218_v10, %v212_v61 }
  0x9f   :  { %190 = vrot.lane.b32.xlu1 %v179_v58, %s325_s19  ;;  %245 = vrot.lane.b32.xlu2 %v236_v57, %s325_s19 }
  0xa7   :  { %243 = vrot.lane.b32.xlu1 %v235_v60, %s325_s19 }
  0xaf   :  { %249 = vrot.lane.b32.xlu1 %v238_v62, %s325_s19 }
  0xd9   :  { %v66_v3 = vpop.permute.xlu2 %65 }
  0xe1   :  { %v68_v5 = vpop.permute.xlu2 %67 }
  0xe2   :  { %v74_v6 = vsel %vm73_vm0, %v66_v3, %v68_v5 }
  0xe3   :  { %v78_v8 = vadd.f32 %v74_v6, %v44_v32  ;;  %v149_v32 = vmul.f32 %v427_v44, %v146_v0  ;;  %v162_v44 = vmul.f32 %v159_v4, %v153_v43 }
  0xe5   :  { %v91_v9 = vadd.f32 %v89_v7, %v78_v8 }
  0xe7   :  { %v104_v21 = vadd.f32 %v102_v18, %v91_v9 }
  0xe9   :  { %v128_v19 = vpop.permute.xlu2 %127 }
  0xf1   :  { %v72_v11 = vpop.permute.xlu1 %71  ;;  %v187_v37 = vpop.permute.xlu2 %186 }
  0xf2   :  { %v70_v12 = vpop.permute.xlu0 %69 }
  0xf3   :  { %v75_v13 = vsel %vm73_vm0, %v70_v12, %v72_v11 }
  0xf4   :  { %v79_v16 = vadd.f32 %v75_v13, %v45_v36  ;;  %v161_v36 = vmul.f32 %v159_v4, %v152_v34 }
  0xf6   :  { %v92_v17 = vadd.f32 %v90_v15, %v79_v16 }
  0xf8   :  { %v105_v30 = vadd.f32 %v103_v27, %v92_v17 }
  0xf9   :  { %v126_v20 = vpop.permute.xlu1 %125  ;;  %v246_v56 = vpop.permute.xlu2 %245 }
  0xfa   :  { %v133_v22 = vsel %vm73_vm0, %v126_v20, %v128_v19  ;;  %v130_v28 = vpop.permute.xlu0 %129 }
  0xfb   :  { %v137_v24 = vadd.f32 %v133_v22, %v104_v21 }
  0xfd   :  { %v150_v26 = vadd.f32 %v148_v23, %v137_v24 }
  0xff   :  { %v163_v39 = vadd.f32 %v161_v36, %v150_v26 }
 0x101   :  { %v132_v29 = vpop.permute.xlu1 %131 }
 0x102   :  { %v134_v31 = vsel %vm73_vm0, %v130_v28, %v132_v29  ;;  %v189_v46 = vpop.permute.xlu0 %188 }
 0x103   :  { %v138_v33 = vadd.f32 %v134_v31, %v105_v30 }
 0x105   :  { %v151_v35 = vadd.f32 %v149_v32, %v138_v33 }
 0x107   :  { %v164_v49 = vadd.f32 %v162_v44, %v151_v35 }
 0x109   :  { %v185_v38 = vpop.permute.xlu1 %184 }
 0x10a   :  { %v192_v40 = vsel %vm73_vm0, %v185_v38, %v187_v37  ;;  %v248_v48 = vpop.permute.xlu0 %247 }
 0x10b   :  { %v196_v42 = vadd.f32 %v192_v40, %v163_v39 }
 0x10d   :  { %v209_v45 = vadd.f32 %v207_v41, %v196_v42 }
 0x10f   :  { %v222_v58 = vadd.f32 %v220_v55, %v209_v45 }
 0x111   :  { %v191_v47 = vpop.permute.xlu1 %190 }
 0x112   :  { %v193_v50 = vsel %vm73_vm0, %v189_v46, %v191_v47 }
 0x113   :  { %v197_v52 = vadd.f32 %v193_v50, %v164_v49 }
 0x115   :  { %v210_v54 = vadd.f32 %v208_v51, %v197_v52 }
 0x117   :  { %v223_v1 = vadd.f32 %v221_v63, %v210_v54 }
 0x119   :  { %v244_v57 = vpop.permute.xlu1 %243 }
 0x11a   :  { %v251_v59 = vsel %vm73_vm0, %v244_v57, %v246_v56 }
 0x11b   :  { %v255_v60 = vadd.f32 %v251_v59, %v222_v58 }
 0x11d   :  { %v257_v62 = vmax.f32 %v255_v60, 0.0 }
 0x11f   :  { %259 = vst [vmem:[#allocation2] sm:$0xff] %v257_v62 }
 0x121   :  { %v250_v0 = vpop.permute.xlu1 %249 }
 0x122   :  { %v252_v2 = vsel %vm73_vm0, %v248_v48, %v250_v0 }
 0x123   :  { %v256_v3 = vadd.f32 %v252_v2, %v223_v1 }
 0x125   :  { %v258_v4 = vmax.f32 %v256_v3, 0.0 }
 0x127   :  { %260 = vst [vmem:[#allocation2 + $0x8] sm:$0xff] %v258_v4 }
 0x128   :  { %273 = dma.vmem_to_hbm [thread:$0]  %s266_s29, 256, %s268_s5, [#allocation3], %s327_s0, %s327_s0, %s328_s6  }
 0x129   :  { %322 = dma.done.wait [#allocation3], 256  }
 0x12a   :  { %323 = vsyncadd [#allocation3], 4294967040 }
 0x12b   :  { %278 = vsyncpa [#allocation3], 1 }

</bundles_post_ra>
